<compile_context>
chip_gen: v7x
topology: tpu7x:2x2x1
jax: 0.10.0
libtpu: 0.0.40
codegen_flags: <defaults>
</compile_context>

<pallas_src>
import jax
import jax.numpy as jnp
from jax import lax
from jax.experimental import pallas as pl
from jax.experimental.pallas import tpu as pltpu

SATELLITE_DISCOUNT = 0.98

# --- static model sizes -----------------------------------------------------
F = 6     # state features
H = 32    # hidden width (actor & critic)
A = 3     # actions

# --- packed parameter slab layout (48 rows x 128 lanes, f32) ----------------
_W1_R0 = 0            # rows [0, F)     lanes [0, 2H) : [aw1 | cw1]           (F, 2H)
_AW2_R0 = 8           # rows [8, 8+H)   lanes [0, A)  : aw2                   (H, A)
_VEC_R0 = _AW2_R0 + H  # rows [40, 48) : vectors / scalars
#   +0 : [ab1 | cb1]      lanes [0, 2H)
#   +1 : drift @ cw1      lanes [0, H)    (precomputed)
#   +2 : cw2 (as row)     lanes [0, H)
#   +3 : ab2              lanes [0, A)
#   +4 : drift            lanes [0, F)
#   +5 : lane 0 = cb2, lane 1 = mean(drift**2)   (precomputed)
_SLAB_ROWS = 48
_SLAB_LANES = 128


def _actor_improved_value_kernel(state_ref, p_ref, out_ref):
    state = state_ref[...]                                   # (B, F) f32
    B = state.shape[0]

    # --- one aligned (8,128) load for all small vectors ----------------------
    vec = p_ref[_VEC_R0:_VEC_R0 + 8, :]                      # (8, 128)
    bias1 = vec[0:1, 0:2 * H]                                # (1, 2H)  [ab1 | cb1]
    dcw1  = vec[1:2, 0:H]                                    # (1, H)   drift @ cw1
    cw2r  = vec[2:3, 0:H]                                    # (1, H)   cw2 as a row
    ab2   = vec[3:4, 0:A]                                    # (1, A)
    drift = vec[4:5, 0:F]                                    # (1, F)
    cb2   = vec[5:6, 0:1]                                    # (1, 1)
    drift_sq_mean = vec[5:6, 1:2]                            # (1, 1)   mean(drift**2)

    # --- action-independent reductions (overlap with the matmuls) ------------
    m_ss = jnp.mean(state * state)                           # mean_{b,f}(s^2)
    m_sd = jnp.mean(state * drift)                           # mean_{b,f}(s*drift)

    # --- fused layer 1 (actor+critic) with folded biases ----------------------
    w1 = p_ref[_W1_R0:_W1_R0 + F, 0:2 * H]                   # (F, 2H)
    h_pre = jnp.dot(state, w1,
                    preferred_element_type=jnp.float32) + bias1        # (B, 2H)

    # --- actor head ------------------------------------------------------------
    aw2 = p_ref[_AW2_R0:_AW2_R0 + H, 0:A]                    # (H, A)
    ha = jnp.maximum(h_pre[:, 0:H], 0.0)                     # (B, H)
    logits = jnp.dot(ha, aw2,
                     preferred_element_type=jnp.float32) + ab2          # (B, A)

    # --- td_transition action: GLOBAL argmax over flattened logits, first hit -
    row = lax.broadcasted_iota(jnp.int32, (B, A), 0)
    col = lax.broadcasted_iota(jnp.int32, (B, A), 1)
    flat_idx = row * A + col
    max_val = jnp.max(logits)
    big = jnp.iinfo(jnp.int32).max
    argmax_flat = jnp.min(jnp.where(logits == max_val, flat_idx, big))
    a = (argmax_flat - 1).astype(jnp.float32)                # 0-d scalar action

    # --- critic head via linearity: next_state@cw1 + cb1 = h_pre_c + a*dcw1 ---
    # Batch mean commuted inside the (H,1) projection -> no MXU matmul after argmax.
    hc = jnp.maximum(h_pre[:, H:2 * H] + a * dcw1, 0.0)      # (B, H)
    hc_mean = jnp.mean(hc, axis=0, keepdims=True)            # (1, H)
    v_mean = jnp.sum(hc_mean * cw2r) + cb2                   # (1, 1) = mean_b(value)

    # --- mean reward = -mean_b mean_f((state + a*drift)^2), expanded -----------
    r_mean = -(m_ss + (2.0 * a) * m_sd + (a * a) * drift_sq_mean)       # (1, 1)

    # --- improved value + final negation ---------------------------------------
    out_ref[...] = -(r_mean + SATELLITE_DISCOUNT * v_mean)   # (1, 1)


def actor_improved_value(state, packed_params):
    """Single grid point; two input DMAs (state + packed parameter slab)."""
    vmem = pl.BlockSpec(memory_space=pltpu.MemorySpace.VMEM)
    out = pl.pallas_call(
        _actor_improved_value_kernel,
        out_shape=jax.ShapeDtypeStruct((1, 1), jnp.float32),
        in_specs=[vmem, vmem],
        out_specs=vmem,
    )(state, packed_params)
    return out[0, 0]


def init_params(key, in_dim=F, hidden=H, n_actions=A):
    """Deterministic PyTorch-Linear-style init (uniform +/- 1/sqrt(fan_in))."""
    ks = jax.random.split(key, 5)

    def lin(k, fan_in, fan_out):
        bound = 1.0 / jnp.sqrt(jnp.float32(fan_in))
        kw, kb = jax.random.split(k)
        w = jax.random.uniform(kw, (fan_in, fan_out), jnp.float32, -bound, bound)
        b = jax.random.uniform(kb, (1, fan_out), jnp.float32, -bound, bound)
        return w, b

    aw1, ab1 = lin(ks[0], in_dim, hidden)
    aw2, ab2 = lin(ks[1], hidden, n_actions)
    cw1, cb1 = lin(ks[2], in_dim, hidden)
    cw2, cb2 = lin(ks[3], hidden, 1)
    drift = jax.random.normal(ks[4], (1, in_dim), jnp.float32) * 0.1
    return dict(aw1=aw1, ab1=ab1, aw2=aw2, ab2=ab2, drift=drift,
                cw1=cw1, cb1=cb1, cw2=cw2, cb2=cb2)


def pack_params(params):
    """Pack all parameters + precomputed constants into one (48,128) f32 slab."""
    slab = jnp.zeros((_SLAB_ROWS, _SLAB_LANES), jnp.float32)
    w1 = jnp.concatenate([params["aw1"], params["cw1"]], axis=1)       # (F, 2H)
    bias1 = jnp.concatenate([params["ab1"], params["cb1"]], axis=1)    # (1, 2H)
    drift = params["drift"]                                            # (1, F)
    drift_cw1 = drift @ params["cw1"]                                  # (1, H)
    drift_sq_mean = jnp.mean(drift * drift)                            # scalar

    slab = slab.at[_W1_R0:_W1_R0 + F, 0:2 * H].set(w1)
    slab = slab.at[_AW2_R0:_AW2_R0 + H, 0:A].set(params["aw2"])
    slab = slab.at[_VEC_R0 + 0, 0:2 * H].set(bias1[0])
    slab = slab.at[_VEC_R0 + 1, 0:H].set(drift_cw1[0])
    slab = slab.at[_VEC_R0 + 2, 0:H].set(params["cw2"][:, 0])
    slab = slab.at[_VEC_R0 + 3, 0:A].set(params["ab2"][0])
    slab = slab.at[_VEC_R0 + 4, 0:F].set(drift[0])
    slab = slab.at[_VEC_R0 + 5, 0].set(params["cb2"][0, 0])
    slab = slab.at[_VEC_R0 + 5, 1].set(drift_sq_mean)
    return slab


def _reference(state, params):
    """Pure-JAX reference computing the original (unfused) math."""
    h = jnp.maximum(state @ params["aw1"] + params["ab1"], 0.0)
    logits = h @ params["aw2"] + params["ab2"]
    a = (jnp.argmax(logits) - 1).astype(jnp.float32)
    next_state = state + a * params["drift"]
    reward = -jnp.mean(next_state ** 2, axis=-1, keepdims=True)
    hc = jnp.maximum(next_state @ params["cw1"] + params["cb1"], 0.0)
    value = hc @ params["cw2"] + params["cb2"]
    improved = reward + SATELLITE_DISCOUNT * value
    return -jnp.mean(improved)


if __name__ == "__main__":
    key = jax.random.PRNGKey(0)
    k_state, k_params = jax.random.split(key)

    B = 8                                   # (batch_size, 6) camera state
    state = jax.random.normal(k_state, (B, F), jnp.float32)
    params = init_params(k_params)
    slab = pack_params(params)

    out = actor_improved_value(state, slab)
    out = jax.block_until_ready(out)

    ref = _reference(state, params)
    # Algebraic refactoring (layer-1 fusion, mean commutation, reward expansion)
    # changes floating-point rounding order slightly.
    assert jnp.allclose(out, ref, atol=1e-4, rtol=1e-4), (out, ref)

    print("KERNEL_OK")
</pallas_src>

<mosaic_0001>
module attributes {stable_mosaic.version = 11 : i64} {
  func.func @_actor_improved_value_kernel(%arg0: memref<8x6xf32, #tpu.memory_space<vmem>>, %arg1: memref<48x128xf32, #tpu.memory_space<vmem>>, %arg2: memref<1x1xf32, #tpu.memory_space<vmem>>) attributes {dimension_semantics = [], scalar_prefetch = 0 : i64, scratch_operands = 0 : i64, tpu.core_type = #tpu.core_type<tc>} {
    %c0 = arith.constant 0 : index
    %c0_0 = arith.constant 0 : index
    %0 = vector.load %arg0[%c0, %c0_0] : memref<8x6xf32, #tpu.memory_space<vmem>>, vector<8x6xf32>
    %c40 = arith.constant 40 : index
    %c0_1 = arith.constant 0 : index
    %1 = vector.load %arg1[%c40, %c0_1] : memref<48x128xf32, #tpu.memory_space<vmem>>, vector<8x128xf32>
    %2 = vector.extract_strided_slice %1 {offsets = [0, 0], sizes = [1, 64], strides = [1, 1]} : vector<8x128xf32> to vector<1x64xf32>
    %3 = vector.extract_strided_slice %1 {offsets = [1, 0], sizes = [1, 32], strides = [1, 1]} : vector<8x128xf32> to vector<1x32xf32>
    %4 = vector.extract_strided_slice %1 {offsets = [2, 0], sizes = [1, 32], strides = [1, 1]} : vector<8x128xf32> to vector<1x32xf32>
    %5 = vector.extract_strided_slice %1 {offsets = [3, 0], sizes = [1, 3], strides = [1, 1]} : vector<8x128xf32> to vector<1x3xf32>
    %6 = vector.extract_strided_slice %1 {offsets = [4, 0], sizes = [1, 6], strides = [1, 1]} : vector<8x128xf32> to vector<1x6xf32>
    %7 = vector.extract_strided_slice %1 {offsets = [5, 0], sizes = [1, 1], strides = [1, 1]} : vector<8x128xf32> to vector<1x1xf32>
    %8 = vector.extract_strided_slice %1 {offsets = [5, 1], sizes = [1, 1], strides = [1, 1]} : vector<8x128xf32> to vector<1x1xf32>
    %9 = arith.mulf %0, %0 : vector<8x6xf32>
    %10 = vector.shape_cast %9 : vector<8x6xf32> to vector<1x8x6xf32>
    %cst = arith.constant dense<0.000000e+00> : vector<1xf32>
    %11 = vector.multi_reduction <add>, %10, %cst [1, 2] : vector<1x8x6xf32> to vector<1xf32>
    %12 = vector.shape_cast %11 : vector<1xf32> to vector<1x1x1xf32>
    %13 = vector.extract %12[0, 0, 0] : f32 from vector<1x1x1xf32>
    %cst_2 = arith.constant 4.800000e+01 : f32
    %14 = arith.divf %13, %cst_2 : f32
    %15 = vector.broadcast %6 : vector<1x6xf32> to vector<8x6xf32>
    %16 = arith.mulf %0, %15 : vector<8x6xf32>
    %17 = vector.shape_cast %16 : vector<8x6xf32> to vector<1x8x6xf32>
    %cst_3 = arith.constant dense<0.000000e+00> : vector<1xf32>
    %18 = vector.multi_reduction <add>, %17, %cst_3 [1, 2] : vector<1x8x6xf32> to vector<1xf32>
    %19 = vector.shape_cast %18 : vector<1xf32> to vector<1x1x1xf32>
    %20 = vector.extract %19[0, 0, 0] : f32 from vector<1x1x1xf32>
    %cst_4 = arith.constant 4.800000e+01 : f32
    %21 = arith.divf %20, %cst_4 : f32
    %c0_5 = arith.constant 0 : index
    %c0_6 = arith.constant 0 : index
    %22 = vector.load %arg1[%c0_5, %c0_6] : memref<48x128xf32, #tpu.memory_space<vmem>>, vector<6x64xf32>
    %cst_7 = arith.constant dense<0.000000e+00> : vector<8x64xf32>
    %23 = tpu.matmul %0, %22, %cst_7 {dimension_numbers = #tpu.dot_dimension_numbers<[1], [0], [0], [1], [0, 0, 1, 1], [], []>} : vector<8x6xf32>, vector<6x64xf32>, vector<8x64xf32> -> vector<8x64xf32>
    %24 = vector.broadcast %2 : vector<1x64xf32> to vector<8x64xf32>
    %25 = arith.addf %23, %24 : vector<8x64xf32>
    %c8 = arith.constant 8 : index
    %c0_8 = arith.constant 0 : index
    %26 = vector.load %arg1[%c8, %c0_8] : memref<48x128xf32, #tpu.memory_space<vmem>>, vector<32x3xf32>
    %27 = vector.extract_strided_slice %25 {offsets = [0, 0], sizes = [8, 32], strides = [1, 1]} : vector<8x64xf32> to vector<8x32xf32>
    %cst_9 = arith.constant 0.000000e+00 : f32
    %28 = vector.broadcast %cst_9 : f32 to vector<8x32xf32>
    %29 = arith.maximumf %27, %28 : vector<8x32xf32>
    %cst_10 = arith.constant dense<0.000000e+00> : vector<8x3xf32>
    %30 = tpu.matmul %29, %26, %cst_10 {dimension_numbers = #tpu.dot_dimension_numbers<[1], [0], [0], [1], [0, 0, 1, 1], [], []>} : vector<8x32xf32>, vector<32x3xf32>, vector<8x3xf32> -> vector<8x3xf32>
    %31 = vector.broadcast %5 : vector<1x3xf32> to vector<8x3xf32>
    %32 = arith.addf %30, %31 : vector<8x3xf32>
    %33 = tpu.iota {dimensions = array<i32: 0>} : vector<8x3xi32>
    %34 = tpu.iota {dimensions = array<i32: 1>} : vector<8x3xi32>
    %c3_i32 = arith.constant 3 : i32
    %35 = vector.broadcast %c3_i32 : i32 to vector<8x3xi32>
    %36 = arith.muli %33, %35 : vector<8x3xi32>
    %37 = arith.addi %36, %34 : vector<8x3xi32>
    %38 = vector.shape_cast %32 : vector<8x3xf32> to vector<1x8x3xf32>
    %cst_11 = arith.constant dense<0xFF800000> : vector<1xf32>
    %39 = vector.multi_reduction <maximumf>, %38, %cst_11 [1, 2] : vector<1x8x3xf32> to vector<1xf32>
    %40 = vector.shape_cast %39 : vector<1xf32> to vector<1x1x1xf32>
    %41 = vector.extract %40[0, 0, 0] : f32 from vector<1x1x1xf32>
    %42 = vector.broadcast %41 : f32 to vector<8x3xf32>
    %43 = arith.cmpf oeq, %32, %42 : vector<8x3xf32>
    %c2147483647_i32 = arith.constant 2147483647 : i32
    %44 = vector.broadcast %c2147483647_i32 : i32 to vector<8x3xi32>
    %45 = arith.select %43, %37, %44 : vector<8x3xi1>, vector<8x3xi32>
    %46 = vector.shape_cast %45 : vector<8x3xi32> to vector<1x8x3xi32>
    %cst_12 = arith.constant dense<2147483647> : vector<1xi32>
    %47 = vector.multi_reduction <minsi>, %46, %cst_12 [1, 2] : vector<1x8x3xi32> to vector<1xi32>
    %48 = vector.shape_cast %47 : vector<1xi32> to vector<1x1x1xi32>
    %49 = vector.extract %48[0, 0, 0] : i32 from vector<1x1x1xi32>
    %c1_i32 = arith.constant 1 : i32
    %50 = arith.subi %49, %c1_i32 : i32
    %51 = arith.sitofp %50 : i32 to f32
    %52 = vector.extract_strided_slice %25 {offsets = [0, 32], sizes = [8, 32], strides = [1, 1]} : vector<8x64xf32> to vector<8x32xf32>
    %53 = vector.broadcast %51 : f32 to vector<1x32xf32>
    %54 = arith.mulf %53, %3 : vector<1x32xf32>
    %55 = vector.broadcast %54 : vector<1x32xf32> to vector<8x32xf32>
    %56 = arith.addf %52, %55 : vector<8x32xf32>
    %cst_13 = arith.constant 0.000000e+00 : f32
    %57 = vector.broadcast %cst_13 : f32 to vector<8x32xf32>
    %58 = arith.maximumf %56, %57 : vector<8x32xf32>
    %cst_14 = arith.constant dense<0.000000e+00> : vector<32xf32>
    %59 = vector.multi_reduction <add>, %58, %cst_14 [0] : vector<8x32xf32> to vector<32xf32>
    %60 = vector.shape_cast %59 : vector<32xf32> to vector<1x32xf32>
    %cst_15 = arith.constant 8.000000e+00 : f32
    %61 = vector.broadcast %cst_15 : f32 to vector<1x32xf32>
    %62 = arith.divf %60, %61 : vector<1x32xf32>
    %63 = arith.mulf %62, %4 : vector<1x32xf32>
    %64 = vector.shape_cast %63 : vector<1x32xf32> to vector<1x1x32xf32>
    %cst_16 = arith.constant dense<0.000000e+00> : vector<1xf32>
    %65 = vector.multi_reduction <add>, %64, %cst_16 [1, 2] : vector<1x1x32xf32> to vector<1xf32>
    %66 = vector.shape_cast %65 : vector<1xf32> to vector<1x1x1xf32>
    %67 = vector.extract %66[0, 0, 0] : f32 from vector<1x1x1xf32>
    %68 = vector.broadcast %67 : f32 to vector<1x1xf32>
    %69 = arith.addf %68, %7 : vector<1x1xf32>
    %cst_17 = arith.constant 2.000000e+00 : f32
    %70 = arith.mulf %cst_17, %51 : f32
    %71 = arith.mulf %70, %21 : f32
    %72 = arith.addf %14, %71 : f32
    %73 = arith.mulf %51, %51 : f32
    %74 = vector.broadcast %73 : f32 to vector<1x1xf32>
    %75 = arith.mulf %74, %8 : vector<1x1xf32>
    %76 = vector.broadcast %72 : f32 to vector<1x1xf32>
    %77 = arith.addf %76, %75 : vector<1x1xf32>
    %cst_18 = arith.constant 0.000000e+00 : f32
    %78 = vector.broadcast %cst_18 : f32 to vector<1x1xf32>
    %79 = arith.subf %78, %77 : vector<1x1xf32>
    %cst_19 = arith.constant 9.800000e-01 : f32
    %80 = vector.broadcast %cst_19 : f32 to vector<1x1xf32>
    %81 = arith.mulf %80, %69 : vector<1x1xf32>
    %82 = arith.addf %79, %81 : vector<1x1xf32>
    %cst_20 = arith.constant 0.000000e+00 : f32
    %83 = vector.broadcast %cst_20 : f32 to vector<1x1xf32>
    %84 = arith.subf %83, %82 : vector<1x1xf32>
    %c0_21 = arith.constant 0 : index
    %c0_22 = arith.constant 0 : index
    %85 = vector.load %arg2[%c0_21, %c0_22] : memref<1x1xf32, #tpu.memory_space<vmem>>, vector<1x1xf32>
    tpu.vector_store %arg2[%c0_21, %c0_22], %84 {strides = array<i32>} : memref<1x1xf32, #tpu.memory_space<vmem>>, vector<1x1xf32>,
    return
  }
}

</mosaic_0001>

<bundles_post_ra>
// kernel: tpu_custom_call.1
= control target key start
LH: loop header
LB: loop body
LE: loop exit
PB: predicated region body
PF: predicated region fallthrough
CT: control target
= control target key end

     0   :  { %7 = vsyncpa [#allocation3], 0  ;;  %s598_s0 = inlined_call_operand.hbm [shape: f32[8,6], index: 0, kind: input, shape index: {}]   ;;  %s599_s1 = inlined_call_operand.hbm [shape: f32[48,128], index: 1, kind: input, shape index: {}]   ;;  %s600_s2 = inlined_call_operand.hbm [shape: f32[1,1], index: 2, kind: output, shape index: {}]  }
   0x1   :  { %8 = vsyncpa [#allocation6], 0 }
   0x2   :  { %9 = vsyncpa [#allocation4], 0  ;;  %s495_s9 = smov [#allocation2]   ;;  %s496_s11 = smov [#allocation5]  }
   0x3   :  { %s16_s10 = sshll.u32 %s495_s9, 4  ;;  %s25_s12 = sshll.u32 %s496_s11, 4  ;;  %s17_s10 = int_to_ptr.vmem [resolvable:$true] %s16_s10  ;;  %s522_s12 = int_to_ptr.vmem [resolvable:$true] %s25_s12 }
   0x4   :  { %s423_s15 = scalar_lea.hbm %s598_s0, 128 }
   0x5   :  { %p424_p0 = scmp.ne.s32.totalorder %s598_s0, %s423_s15  ;;  %p427_p1 = scmp.lt.u32.totalorder %s423_s15, %s598_s0 }
   0x7   :  { %p429_p2 = pnand %p427_p1, %p424_p0 }
   0x9   :  { %432 = shalt.err (!%p429_p2)
}
   0xa   :  { %s433_s20 = scalar_lea.vmem %s17_s10, 128  ;;  %p438_p4 = scmp.lt.s32.totalorder %s17_s10, %s17_s10 }
   0xb   :  { %p434_p3 = scmp.ne.s32.totalorder %s17_s10, %s433_s20  ;;  %p439_p5 = scmp.lt.s32.totalorder %s433_s20, %s433_s20 }
   0xd   :  { %p440_p6 = por %p439_p5, %p438_p4 }
   0xf   :  { %p441_p7 = pnand %p440_p6, %p434_p3 }
  0x11   :  { %444 = shalt.err (!%p441_p7)
}
  0x12   :  { %19 = dma.hbm_to_vmem [thread:$0]  %s598_s0, 128, %s17_s10, [#allocation3]  }
  0x13   :  { %s445_s25 = scalar_lea.hbm %s599_s1, 768 }
  0x14   :  { %p446_p8 = scmp.ne.s32.totalorder %s599_s1, %s445_s25  ;;  %p449_p9 = scmp.lt.u32.totalorder %s445_s25, %s599_s1 }
  0x16   :  { %p451_p10 = pnand %p449_p9, %p446_p8 }
  0x18   :  { %454 = shalt.err (!%p451_p10)
}
  0x19   :  { %s455_s30 = scalar_lea.vmem %s522_s12, 768  ;;  %p460_p12 = scmp.lt.s32.totalorder %s522_s12, %s522_s12 }
  0x1a   :  { %p456_p11 = scmp.ne.s32.totalorder %s522_s12, %s455_s30  ;;  %p461_p13 = scmp.lt.s32.totalorder %s455_s30, %s455_s30 }
  0x1c   :  { %p462_p0 = por %p461_p13, %p460_p12 }
  0x1e   :  { %p463_p1 = pnand %p462_p0, %p456_p11 }
  0x20   :  { %466 = shalt.err (!%p463_p1)
}
  0x21   :  { %s497_s0 = smov 128   ;;  %s498_s3 = smov 8  }
  0x22   :  { %31 = dma.hbm_to_vmem [thread:$0]  %s599_s1, 768, %s522_s12, [#allocation6], %s497_s0, %s497_s0, %s498_s3  }
  0x23   :  { %489 = dma.done.wait [#allocation3], 128  }
  0x24   :  { %490 = vsyncadd [#allocation3], 4294967168 }
  0x25   :  { %491 = dma.done.wait [#allocation6], 768  }
  0x26   :  { %492 = vsyncadd [#allocation6], 4294966528  ;;  %v499_v0 = vmov 0.0   ;;  %vm500_vm0 = vmmov 0   ;;  %v501_v1 = vmov 0.0|0.0   ;;  %vm81_vm1 = vcmask 1045504  }
  0x27   :  { %379 = vmatprep.subr.mxu0 %v499_v0  ;;  %381 = vmatprep.mubr.msk.f32.mxu0 %vm500_vm0, %v499_v0  ;;  %vm41_vm2 = vcmask 48128   ;;  %v73_v2 = vld [vmem:[#allocation5] sm:$0x3f]  ;;  %v38_v3 = vld [vmem:[#allocation2] sm:$0xff]  ;;  %v155_v4 = vld [vmem:[#allocation5 + $0x8] sm:$0xff]  ;;  %v55_v7 = vlaneseq  ;;  %vm164_vm3 = vcmask 261120  }
  0x28   :  { %395 = vmatprep.subr.bf16.mxu1 %v501_v1  ;;  %392 = vmatprep.mubr.msk.f32.mxu1 %vm500_vm0, %v499_v0  ;;  %v156_v5 = vld [vmem:[#allocation5 + $0x10] sm:$0xff]  ;;  %v157_v8 = vld [vmem:[#allocation5 + $0x18] sm:$0xff]  ;;  %v158_v9 = vld [vmem:[#allocation5 + $0x20] sm:$0xff]  ;;  %v40_v12 = vmul.f32 %v38_v3, %v38_v3  ;;  %vm244_vm4 = vcmask 23552   ;;  %s502_s8 = smov 32   ;;  %vm297_vm10 = vcmask 523520  }
  0x29   :  { %380 = vmatpush3.msk.msra.mxu0 %vm81_vm1, %v73_v2  ;;  %v396_v6 = vpack.c.bf16 %v156_v5, %v155_v4  ;;  %v399_v10 = vpack.c.bf16 %v158_v9, %v157_v8  ;;  %v554_v11 = vshrl.u32 %v55_v7, 7  ;;  %v557_v14 = vld [vmem:[#allocation5 + $0x28] sm:$0xff]  ;;  %v241_v52 = vand.u32 127, %v55_v7  ;;  %s503_s18 = smov 96   ;;  %s504_s20 = smov 1  }
  0x2a   :  { %382 = vmatmul.mubr.msk.f32.vlgmr.msra.gmra.mrb[0].mxu0 %vm41_vm2, %v38_v3  ;;  %v42_v15 = vsel %vm41_vm2, %v40_v12, 0.0  ;;  %v308_v0 = vrot.slane %v557_v14, 2  ;;  %vm317_vm11 = vcmask 253952   ;;  %s505_s21 = smov 127   ;;  %s506_s22 = smov [#allocation7]   ;;  %vm350_vm12 = vcmask 5125  }
  0x2b   :  { %397 = vmatpush3.bf16.msra.mxu1 %v396_v6  ;;  %v57_v13 = vsub.s32 4, %v554_v11  ;;  %43 = vadd.xlane.f32.xlu0 %v42_v15  ;;  %v76_v19 = vsub.s32 0, %v554_v11  ;;  %v162_v25 = vsub.s32 3, %v554_v11  ;;  %v242_v53 = vmul.u32 3, %v554_v11  ;;  %s358_s23 = sshll.u32 %s506_s22, 4  ;;  %s359_s23 = int_to_ptr.vmem [resolvable:$true] %s358_s23 }
  0x2c   :  { %398 = vmatprep.subr.bf16.mxu1 %v501_v1  ;;  %s467_s24 = scalar_lea.vmem %s359_s23, 16  ;;  %s471_s25 = scalar_lea.vmem %s359_s23, 32 }
  0x2d   :  { %v58_v16 = vrot.slane %v557_v14, %v57_v13  ;;  %v77_v20 = vrot.slane %v557_v14, %v76_v19  ;;  %v163_v26 = vrot.slane %v557_v14, %v162_v25  ;;  %v243_v54 = vadd.s32 %v242_v53, %v241_v52  ;;  %p468_p2 = scmp.ne.s32.totalorder %s359_s23, %s467_s24  ;;  %p472_p3 = scmp.lt.s32.totalorder %s359_s23, %s359_s23 }
  0x2e   :  { %v289_v13 = vsub.s32 1, %v554_v11  ;;  %p473_p4 = scmp.lt.s32.totalorder %s471_s25, %s467_s24 }
  0x2f   :  { %400 = vmatpush3.bf16.msra.mxu1 %v399_v10  ;;  %v59_v17 = vmul.f32 %v58_v16, %v38_v3 }
  0x30   :  { %p474_p5 = por %p473_p4, %p472_p3 }
  0x31   :  { %v60_v18 = vsel %vm41_vm2, %v59_v17, 0.0 }
  0x32   :  { %61 = vadd.xlane.f32.xlu0 %v60_v18  ;;  %p475_p6 = pnand %p474_p5, %p468_p2 }
  0xb8   :  { %v44_v27 = vpop.xlane.xlu0 %43 }
  0xb9   :  { %v45_v31 = vrot.slane %v44_v27, 4 }
  0xbb   :  { %v46_v34 = vadd.f32 %v45_v31, %v44_v27 }
  0xbd   :  { %v47_v36 = vrot.slane %v46_v34, 2 }
  0xbf   :  { %v62_v33 = vpop.xlane.xlu0 %61  ;;  %v48_v39 = vadd.f32 %v47_v36, %v46_v34 }
  0xc0   :  { %v63_v35 = vrot.slane %v62_v33, 4 }
  0xc1   :  { %v49_v40 = vrot.slane %v48_v39, 1 }
  0xc2   :  { %v64_v37 = vadd.f32 %v63_v35, %v62_v33 }
  0xc3   :  { %v50_v41 = vadd.f32 %v49_v40, %v48_v39 }
  0xc4   :  { %v65_v38 = vrot.slane %v64_v37, 2 }
  0xc5   :  { %401 = vpush %v50_v41 }
  0xc6   :  { %v66_v42 = vadd.f32 %v65_v38, %v64_v37 }
  0xc8   :  { %v67_v43 = vrot.slane %v66_v42, 1 }
  0xca   :  { %v68_v44 = vadd.f32 %v67_v43, %v66_v42 }
  0xcc   :  { %403 = vpush %v68_v44 }
  0xf6   :  { %s571_s1 = spop %401 }
  0xf7   :  { %s54_s11 = smul.f32 0.020833334, %s571_s1 }
  0xfd   :  { %v151_v21 = vpop.f32.mrb[0].mxu0  ;;  %s573_s6 = spop %403 }
  0xfe   :  { %v564_v22 = vadd.f32 %v151_v21, %v77_v20  ;;  %v383_v23 = vpop.f32.mrb[1].mxu0  ;;  %s72_s13 = smul.f32 0.020833334, %s573_s6 }
 0x100   :  { %v159_v24 = vmax.f32 %v564_v22, 0.0 }
 0x102   :  { %393 = vmatmul.mubr.msk.f32.vlgmr.msra.gmra.mrb[0].mxu1 %vm164_vm3, %v159_v24 }
 0x1d5   :  { %v234_v28 = vpop.f32.mrb[0].mxu1 }
 0x1d6   :  { %v235_v29 = vadd.f32 %v234_v28, %v163_v26  ;;  %v394_v30 = vpop.f32.mrb[1].mxu1 }
 0x1d8   :  { %v245_v32 = vsel %vm244_vm4, %v235_v29, -inf }
 0x1d9   :  { %246 = vmax.xlane.f32.xlu1 %v245_v32 }
 0x266   :  { %v247_v45 = vpop.xlane.xlu1 %246 }
 0x267   :  { %v248_v46 = vrot.slane %v247_v45, 4 }
 0x269   :  { %v249_v47 = vmax.f32 %v247_v45, %v248_v46 }
 0x26b   :  { %v250_v48 = vrot.slane %v249_v47, 2 }
 0x26d   :  { %v251_v49 = vmax.f32 %v249_v47, %v250_v48 }
 0x26f   :  { %v252_v50 = vrot.slane %v251_v49, 1 }
 0x271   :  { %v253_v51 = vmax.f32 %v251_v49, %v252_v50 }
 0x273   :  { %405 = vpush %v253_v51 }
 0x2a4   :  { %s406_s7 = spop %405 }
 0x2a5   :  { %v255_v55 = vstv %s406_s7 }
 0x2a6   :  { %vm256_vm5 = vcmp.eq.f32.partialorder %v235_v29, %v255_v55 }
 0x2a7   :  { %v257_v56 = vsel %vm256_vm5, %v243_v54, 2147483647 }
 0x2a8   :  { %v258_v57 = vsel %vm244_vm4, %v257_v56, 2147483647 }
 0x2a9   :  { %v260_v58 = vshra.s32 %v258_v57, 16  ;;  %v259_v60 = vand.u32 65535, %v258_v57 }
 0x2ab   :  { %v262_v59 = vcvt.s32.f32 %v260_v58  ;;  %v261_v62 = vcvt.s32.f32 %v259_v60 }
 0x2ad   :  { %263 = vmin.xlane.f32.xlu1 %v262_v59 }
 0x33a   :  { %v264_v61 = vpop.xlane.xlu1 %263 }
 0x33b   :  { %vm265_vm6 = vcmp.eq.f32.partialorder %v262_v59, %v264_v61  ;;  %v270_v1 = vcvt.f32.s32 %v264_v61 }
 0x33c   :  { %v266_v63 = vsel %vm265_vm6, %v261_v62, inf }
 0x33d   :  { %267 = vmin.xlane.f32.xlu0 %v266_v63  ;;  %v271_v3 = vshll.u32 %v270_v1, 16 }
 0x353   :  { %309 = vrot.lane.b32.xlu0 %v308_v0, %s502_s8 }
 0x3ca   :  { %v268_v2 = vpop.xlane.xlu0 %267 }
 0x3cb   :  { %v269_v4 = vcvt.f32.s32 %v268_v2 }
 0x3cd   :  { %v272_v5 = vadd.s32 %v271_v3, %v269_v4 }
 0x3ce   :  { %v310_v32 = vpop.permute.xlu0 %309 }
 0x3cf   :  { %v273_v6 = vrot.slane %v272_v5, 4 }
 0x3d1   :  { %vm274_vm7 = vcmp.lt.s32.totalorder %v272_v5, %v273_v6 }
 0x3d2   :  { %v275_v7 = vsel %vm274_vm7, %v272_v5, %v273_v6 }
 0x3d3   :  { %v276_v8 = vrot.slane %v275_v7, 2 }
 0x3d5   :  { %vm277_vm8 = vcmp.lt.s32.totalorder %v275_v7, %v276_v8 }
 0x3d6   :  { %v278_v9 = vsel %vm277_vm8, %v275_v7, %v276_v8 }
 0x3d7   :  { %v279_v10 = vrot.slane %v278_v9, 1 }
 0x3d9   :  { %vm280_vm9 = vcmp.lt.s32.totalorder %v278_v9, %v279_v10 }
 0x3da   :  { %v281_v12 = vsel %vm280_vm9, %v278_v9, %v279_v10 }
 0x3db   :  { %407 = vpush %v281_v12 }
 0x40c   :  { %s408_s9 = spop %407 }
 0x40d   :  { %s371_s10 = sadd.s32 4294967295, %s408_s9 }
 0x40e   :  { %s284_s12 = scvt.s32.f32 %s371_s10 }
 0x410   :  { %v285_v15 = vstv %s284_s12  ;;  %s330_s14 = smul.f32 2.0, %s284_s12 }
 0x411   :  { %s333_s15 = smul.f32 %s284_s12, %s284_s12  ;;  %v286_v16 = vmul.f32 %v285_v15, %v557_v14 }
 0x412   :  { %s331_s16 = smul.f32 %s330_s14, %s72_s13 }
 0x413   :  { %v334_v17 = vstv %s333_s15  ;;  %v290_v18 = vrot.slane %v286_v16, %v289_v13 }
 0x414   :  { %s332_s17 = sadd.f32 %s331_s16, %s54_s11  ;;  %v335_v19 = vmul.f32 %v334_v17, %v557_v14 }
 0x415   :  { %292 = vrot.lane.b32.xlu1 %v290_v18, %s502_s8 }
 0x416   :  { %v336_v20 = vstv %s332_s17 }
 0x417   :  { %v337_v21 = vadd.f32 %v336_v20, %v335_v19 }
 0x419   :  { %v338_v46 = vsub.f32 0.0, %v337_v21 }
 0x487   :  { %v293_v23 = vpop.permute.xlu1 %292 }
 0x488   :  { %v295_v24 = vadd.f32 %v293_v23, %v564_v22 }
 0x48a   :  { %v296_v11 = vmax.f32 %v295_v24, 0.0 }
 0x48c   :  { %v298_v25 = vsel %vm297_vm10, %v296_v11, 0.0 }
 0x48d   :  { %v299_v26 = vrot.slane %v298_v25, 4 }
 0x48f   :  { %v300_v27 = vadd.f32 %v299_v26, %v298_v25 }
 0x491   :  { %v301_v28 = vrot.slane %v300_v27, 2 }
 0x493   :  { %v302_v29 = vadd.f32 %v301_v28, %v300_v27 }
 0x495   :  { %v303_v30 = vrot.slane %v302_v29, 1 }
 0x497   :  { %v304_v31 = vadd.f32 %v303_v30, %v302_v29 }
 0x499   :  { %v306_v33 = vmul.f32 0.125, %v304_v31 }
 0x49b   :  { %v312_v34 = vmul.f32 %v310_v32, %v306_v33 }
 0x49d   :  { %314 = vrot.lane.b32.xlu1 %v312_v34, %s503_s18 }
 0x50f   :  { %v315_v35 = vpop.permute.xlu1 %314 }
 0x510   :  { %v318_v36 = vsel %vm317_vm11, %v315_v35, 0.0 }
 0x511   :  { %319 = vadd.xlane.f32.xlu1 %v318_v36 }
 0x59e   :  { %v320_v37 = vpop.xlane.xlu1 %319 }
 0x59f   :  { %v321_v22 = vrot.slane %v320_v37, 4 }
 0x5a1   :  { %v322_v38 = vadd.f32 %v321_v22, %v320_v37 }
 0x5a3   :  { %v323_v39 = vrot.slane %v322_v38, 2 }
 0x5a5   :  { %v324_v40 = vadd.f32 %v323_v39, %v322_v38 }
 0x5a7   :  { %v325_v41 = vrot.slane %v324_v40, 1 }
 0x5a9   :  { %v326_v42 = vadd.f32 %v325_v41, %v324_v40 }
 0x5ab   :  { %409 = vpush %v326_v42 }
 0x5dc   :  { %s410_s19 = spop %409 }
 0x5dd   :  { %v328_v43 = vstv %s410_s19 }
 0x5de   :  { %v329_v44 = vadd.f32 %v328_v43, %v557_v14 }
 0x5e0   :  { %v339_v45 = vmul.f32 0.98, %v329_v44 }
 0x5e2   :  { %341 = vrot.lane.b32.xlu0 %v339_v45, %s504_s20 }
 0x654   :  { %v342_v47 = vpop.permute.xlu0 %341 }
 0x655   :  { %v344_v48 = vadd.f32 %v342_v47, %v338_v46 }
 0x657   :  { %v345_v49 = vsub.f32 0.0, %v344_v48 }
 0x659   :  { %347 = vrot.lane.b32.xlu0 %v345_v49, %s505_s21 }
 0x6cb   :  { %v348_v50 = vpop.permute.xlu0 %347 }
 0x6cc   :  { %351 = vst.msk [vmem:[#allocation7 - $0x5] sm:$0x20] %vm350_vm12, %v348_v50 }
 0x6cd   :  { %478 = shalt.err (!%p475_p6)
}
 0x6ce   :  { %s479_s28 = scalar_lea.hbm %s600_s2, 16 }
 0x6cf   :  { %p480_p7 = scmp.ne.s32.totalorder %s600_s2, %s479_s28  ;;  %p483_p8 = scmp.lt.u32.totalorder %s479_s28, %s600_s2 }
 0x6d1   :  { %p485_p9 = pnand %p483_p8, %p480_p7 }
 0x6d3   :  { %488 = shalt.err (!%p485_p9)
}
 0x6d4   :  { %361 = dma.vmem_to_hbm [thread:$0]  %s359_s23, 16, %s600_s2, [#allocation4]  }
 0x6d5   :  { %493 = dma.done.wait [#allocation4], 16  }
 0x6d6   :  { %494 = vsyncadd [#allocation4], 4294967280 }
 0x6d7   :  { %365 = vsyncpa [#allocation3], 1 }
 0x6d8   :  { %366 = vsyncpa [#allocation6], 1 }
 0x6d9   :  { %367 = vsyncpa [#allocation4], 1 }

</bundles_post_ra>
